<compile_context>
chip_gen: v5e
topology: v5e:2x2
jax: 0.10.0
libtpu: 0.0.40
codegen_flags: <defaults>
</compile_context>

<pallas_src>
import functools

import numpy as np

import jax
import jax.numpy as jnp
from jax.experimental import pallas as pl
from jax.experimental.pallas import tpu as pltpu

EPS = 1e-3  # CharbonnierLoss default eps

# Deterministic "parameters": the 1-D / 2-D Gaussian of EdgeLoss (same for every channel).
_GK1D = [0.05, 0.25, 0.4, 0.25, 0.05]
_GK2D = [[a * b for b in _GK1D] for a in _GK1D]


# ----------------------------------------------------------------------------
# Host-side constant operators (trace-time numpy, cached per (H, W))
# ----------------------------------------------------------------------------
@functools.lru_cache(maxsize=None)
def _lap_matrices_np(h, w):
    """Constant matrices s.t. Lap(M) = M - Cv @ M @ Ch (exact fold of blur ->
    downsample2 -> zero-upsample*4 -> blur, with replicate-pad clamping)."""

    def blur_clamp(n):
        # a[i, r] = sum_p g[p] * [clip(i + p - 2, 0, n-1) == r]
        a = np.zeros((n, n), np.float64)
        for i in range(n):
            for p, gp in enumerate(_GK1D):
                r = min(max(i + p - 2, 0), n - 1)
                a[i, r] += gp
        return a

    def even_diag(n):
        return np.diag((np.arange(n) % 2 == 0).astype(np.float64))

    av = blur_clamp(h)                      # vertical (row) blur, left-multiplies
    aw = blur_clamp(w)                      # horizontal blur ("output x source")
    cv = 2.0 * av @ even_diag(h) @ av       # (H, H) left operator
    ch = 2.0 * aw.T @ even_diag(w) @ aw.T   # (W, W) right operator
    return cv.astype(np.float32), ch.astype(np.float32)


# ----------------------------------------------------------------------------
# VMEM-aware block / pipeline planning
# ----------------------------------------------------------------------------
def _vmem_capacity_bytes():
    try:
        return int(pltpu.get_tpu_info().vmem_capacity_bytes)
    except Exception:
        return 64 * 1024 * 1024  # conservative: v7x physical VMEM


def _plan_blocks(nc, h, w, in_itemsize):
    """Pick block_c (channels per grid step) and an explicit vmem_limit_bytes.

    Constraints: >=2 grid steps whenever nc >= 2 (megacore sharding + overlap),
    unroll cap of 16 channels, and an estimate of actual per-step VMEM usage that
    must fit under ~75% of physical VMEM (capped at 100 MiB)."""
    cap = _vmem_capacity_bytes()
    limit_cap = min(int(cap * 0.75), 100 * 1024 * 1024)

    op_bytes = 2 * 2 * (h * h + w * w)  # bf16 Cv/Ch, (pessimistically) double-buffered

    def est(bc):
        in_bytes = 2 * 2 * bc * h * w * in_itemsize   # x, y double-buffered blocks
        tmp_bytes = 4 * bc * h * w * 4                # d, t, bf16 copies, sqrt temps
        small = 6 * h * w * 4 + 2 * 2 * 8 * 128 * 4   # per-channel temps + outputs
        return op_bytes + in_bytes + tmp_bytes + small

    max_bc = max(1, min(max(nc // 2, 1), 16))
    best = 1
    for bc in range(1, max_bc + 1):
        if nc % bc == 0 and est(bc) <= limit_cap:
            best = bc
    vmem_limit = int(min(limit_cap, max(2 * est(best), 32 * 1024 * 1024)))
    return best, vmem_limit


# ----------------------------------------------------------------------------
# Fused Pallas kernel: Charbonnier + Edge partial sums per channel tile
# ----------------------------------------------------------------------------
def _weighted_loss_kernel(x_ref, y_ref, cv_ref, ch_ref, charb_ref, edge_ref):
    block_c, h, w = x_ref.shape
    eps2 = jnp.float32(EPS * EPS)

    cv = cv_ref[...]   # (H, H) bf16 row operator (resident across the grid)
    ch = ch_ref[...]   # (W, W) bf16 column operator (resident across the grid)

    # Whole-block diff in f32; Charbonnier term is ONE fused reduction.
    d = x_ref[...].astype(jnp.float32) - y_ref[...].astype(jnp.float32)  # (bc, H, W)
    charb = jnp.sum(jnp.sqrt(d * d + eps2))

    d_bf = d.astype(jnp.bfloat16)

    # Horizontal pass (d @ Ch) batched across channels when the reshape is
    # layout-preserving (H multiple of 8 sublanes); otherwise per-channel fallback.
    if h % 8 == 0:
        t = jnp.dot(d_bf.reshape(block_c * h, w), ch,
                    preferred_element_type=jnp.float32)
        t_bf = t.astype(jnp.bfloat16).reshape(block_c, h, w)
    else:
        t_bf = None

    # Vertical pass per channel (Cv @ t_c) + elementwise Edge-Charbonnier map.
    # Accumulation is a full-width VPU add per channel; only ONE cross-lane
    # reduction per grid step at the end (no scalar RAW chain).
    edge_map = jnp.zeros((h, w), jnp.float32)
    for c in range(block_c):  # static unroll (bounded by the planner at 16)
        if t_bf is None:
            tc = jnp.dot(d_bf[c], ch,
                         preferred_element_type=jnp.float32).astype(jnp.bfloat16)
        else:
            tc = t_bf[c]
        g2 = jnp.dot(cv, tc, preferred_element_type=jnp.float32)   # (H, W), f32 acc
        lap = d[c] - g2                                            # Lap(x-y), exact form
        edge_map = edge_map + jnp.sqrt(lap * lap + eps2)
    edge = jnp.sum(edge_map)

    # Lane-dense, (8,128)-aligned partial-sum blocks (one per grid step).
    charb_ref[...] = jnp.full(charb_ref.shape, charb, jnp.float32)
    edge_ref[...] = jnp.full(edge_ref.shape, edge, jnp.float32)


def _fused_loss_sums(x, y, cv, ch, block_c, vmem_limit):
    """x, y: (NC, H, W) native dtype.  Returns (sum_charbonnier, sum_edge)."""
    nc, h, w = x.shape
    t = nc // block_c
    charb_parts, edge_parts = pl.pallas_call(
        _weighted_loss_kernel,
        out_shape=(
            jax.ShapeDtypeStruct((t, 8, 128), jnp.float32),
            jax.ShapeDtypeStruct((t, 8, 128), jnp.float32),
        ),
        grid=(t,),
        in_specs=[
            pl.BlockSpec((block_c, h, w), lambda i: (i, 0, 0)),
            pl.BlockSpec((block_c, h, w), lambda i: (i, 0, 0)),
            pl.BlockSpec((h, h), lambda i: (0, 0)),   # same block every step -> resident
            pl.BlockSpec((w, w), lambda i: (0, 0)),
        ],
        out_specs=(
            pl.BlockSpec((1, 8, 128), lambda i: (i, 0, 0)),
            pl.BlockSpec((1, 8, 128), lambda i: (i, 0, 0)),
        ),
        compiler_params=pltpu.CompilerParams(
            dimension_semantics=("parallel",),        # v7x: shard channel tiles on 2 TCs
            vmem_limit_bytes=vmem_limit,
        ),
    )(x, y, cv, ch)
    return jnp.sum(charb_parts[:, 0, 0]), jnp.sum(edge_parts[:, 0, 0])


# ----------------------------------------------------------------------------
# Public wrapper: WeightedLoss forward
# ----------------------------------------------------------------------------
@functools.partial(jax.jit, static_argnames=("w_charb", "w_edge"))
def weighted_loss(output, target, w_charb=0.5, w_edge=0.5):
    """WeightedLoss({'CharbonnierLoss': w_charb, 'EdgeLoss': w_edge}).

    output, target: (N, C, H, W). Returns a scalar f32.
    """
    n, c, h, w = output.shape
    nc = n * c
    # keep the native dtype at the HBM boundary; cast to f32 inside the kernel
    x = output.reshape(nc, h, w)
    y = target.reshape(nc, h, w)

    cv_np, ch_np = _lap_matrices_np(h, w)
    cv = jnp.asarray(cv_np).astype(jnp.bfloat16)   # bf16 MXU operands, half VMEM
    ch = jnp.asarray(ch_np).astype(jnp.bfloat16)

    block_c, vmem_limit = _plan_blocks(nc, h, w, x.dtype.itemsize)
    charb_sum, edge_sum = _fused_loss_sums(x, y, cv, ch, block_c, vmem_limit)

    count = jnp.float32(nc * h * w)
    charb = charb_sum / count
    edge = edge_sum / count
    return jnp.float32(w_charb) * charb + jnp.float32(w_edge) * edge


# ----------------------------------------------------------------------------
# Pure-JAX reference (direct transcription of the PyTorch module), for self-check
# ----------------------------------------------------------------------------
def _reference_weighted_loss(output, target, w_charb=0.5, w_edge=0.5):
    k2d = jnp.asarray(_GK2D, jnp.float32)

    def conv_gauss(img):  # img: (N, C, H, W), depthwise 5x5, replicate padding
        _, c_, _, _ = img.shape
        pad = jnp.pad(img, ((0, 0), (0, 0), (2, 2), (2, 2)), mode="edge")
        kern = jnp.broadcast_to(k2d, (c_, 1, 5, 5))
        return jax.lax.conv_general_dilated(
            pad, kern, window_strides=(1, 1), padding="VALID",
            dimension_numbers=("NCHW", "OIHW", "NCHW"), feature_group_count=c_)

    def laplacian(img):
        f = conv_gauss(img)
        down = f[:, :, ::2, ::2]
        nf = jnp.zeros_like(f).at[:, :, ::2, ::2].set(down * 4.0)
        return img - conv_gauss(nf)

    def charb(a, b):
        d = a.astype(jnp.float32) - b.astype(jnp.float32)
        return jnp.mean(jnp.sqrt(d * d + jnp.float32(EPS * EPS)))

    xf = output.astype(jnp.float32)
    yf = target.astype(jnp.float32)
    return (jnp.float32(w_charb) * charb(xf, yf)
            + jnp.float32(w_edge) * charb(laplacian(xf), laplacian(yf)))


if __name__ == "__main__":
    key = jax.random.PRNGKey(0)
    k1, k2, k3, k4 = jax.random.split(key, 4)

    # Primary check: (2, 4, 16, 16) -> nc=8, block_c=4, 2 grid steps, batched path.
    out = jax.random.uniform(k1, (2, 4, 16, 16), dtype=jnp.float32)
    tgt = jax.random.uniform(k2, (2, 4, 16, 16), dtype=jnp.float32)
    loss = weighted_loss(out, tgt)
    jax.block_until_ready(loss)
    assert loss.shape == () and loss.dtype == jnp.float32
    ref = _reference_weighted_loss(out, tgt)
    rel = abs(float(loss) - float(ref)) / max(abs(float(ref)), 1e-8)
    assert rel < 1e-2, f"pallas={float(loss)} ref={float(ref)} rel_err={rel}"

    # Secondary check: non-square, H not a multiple of 8 (per-channel fallback path).
    out2 = jax.random.uniform(k3, (2, 3, 12, 20), dtype=jnp.float32)
    tgt2 = jax.random.uniform(k4, (2, 3, 12, 20), dtype=jnp.float32)
    loss2 = weighted_loss(out2, tgt2)
    jax.block_until_ready(loss2)
    ref2 = _reference_weighted_loss(out2, tgt2)
    rel2 = abs(float(loss2) - float(ref2)) / max(abs(float(ref2)), 1e-8)
    assert rel2 < 1e-2, f"pallas={float(loss2)} ref={float(ref2)} rel_err={rel2}"

    print("KERNEL_OK")
</pallas_src>

<mosaic_0001>
module attributes {stable_mosaic.version = 11 : i64} {
  func.func @_weighted_loss_kernel(%arg0: i32, %arg1: memref<4x16x16xf32, #tpu.memory_space<vmem>>, %arg2: memref<4x16x16xf32, #tpu.memory_space<vmem>>, %arg3: memref<16x16xbf16, #tpu.memory_space<vmem>>, %arg4: memref<16x16xbf16, #tpu.memory_space<vmem>>, %arg5: memref<1x8x128xf32, #tpu.memory_space<vmem>>, %arg6: memref<1x8x128xf32, #tpu.memory_space<vmem>>) attributes {dimension_semantics = [#tpu.dimension_semantics<parallel>], iteration_bounds = array<i64: 2>, scalar_prefetch = 0 : i64, scratch_operands = 0 : i64, tpu.core_type = #tpu.core_type<tc>, window_params = [{transform_indices = @transform_0, window_bounds = array<i64: 4, 16, 16>}, {transform_indices = @transform_1, window_bounds = array<i64: 4, 16, 16>}, {pipeline_mode = #tpu.pipeline_mode<synchronous>, transform_indices = @transform_2, window_bounds = array<i64: 16, 16>}, {pipeline_mode = #tpu.pipeline_mode<synchronous>, transform_indices = @transform_3, window_bounds = array<i64: 16, 16>}, {transform_indices = @transform_4, window_bounds = array<i64: 1, 8, 128>}, {transform_indices = @transform_5, window_bounds = array<i64: 1, 8, 128>}]} {
    %c0 = arith.constant 0 : index
    %c0_0 = arith.constant 0 : index
    %0 = vector.load %arg3[%c0, %c0_0] : memref<16x16xbf16, #tpu.memory_space<vmem>>, vector<16x16xbf16>
    %c0_1 = arith.constant 0 : index
    %c0_2 = arith.constant 0 : index
    %1 = vector.load %arg4[%c0_1, %c0_2] : memref<16x16xbf16, #tpu.memory_space<vmem>>, vector<16x16xbf16>
    %c0_3 = arith.constant 0 : index
    %c0_4 = arith.constant 0 : index
    %c0_5 = arith.constant 0 : index
    %2 = vector.load %arg1[%c0_3, %c0_4, %c0_5] : memref<4x16x16xf32, #tpu.memory_space<vmem>>, vector<4x16x16xf32>
    %c0_6 = arith.constant 0 : index
    %c0_7 = arith.constant 0 : index
    %c0_8 = arith.constant 0 : index
    %3 = vector.load %arg2[%c0_6, %c0_7, %c0_8] : memref<4x16x16xf32, #tpu.memory_space<vmem>>, vector<4x16x16xf32>
    %4 = arith.subf %2, %3 : vector<4x16x16xf32>
    %5 = arith.mulf %4, %4 : vector<4x16x16xf32>
    %cst = arith.constant 9.99999997E-7 : f32
    %6 = vector.broadcast %cst : f32 to vector<4x16x16xf32>
    %7 = arith.addf %5, %6 : vector<4x16x16xf32>
    %8 = math.sqrt %7 : vector<4x16x16xf32>
    %9 = vector.shape_cast %8 : vector<4x16x16xf32> to vector<1x4x16x16xf32>
    %cst_9 = arith.constant dense<0.000000e+00> : vector<1xf32>
    %10 = vector.multi_reduction <add>, %9, %cst_9 [1, 2, 3] : vector<1x4x16x16xf32> to vector<1xf32>
    %11 = vector.shape_cast %10 : vector<1xf32> to vector<1x1x1x1xf32>
    %12 = vector.extract %11[0, 0, 0, 0] : f32 from vector<1x1x1x1xf32>
    %13 = arith.truncf %4 : vector<4x16x16xf32> to vector<4x16x16xbf16>
    %14 = vector.shape_cast %13 : vector<4x16x16xbf16> to vector<64x16xbf16>
    %cst_10 = arith.constant dense<0.000000e+00> : vector<64x16xf32>
    %15 = tpu.matmul %14, %1, %cst_10 {dimension_numbers = #tpu.dot_dimension_numbers<[1], [0], [0], [1], [0, 0, 1, 1], [], []>} : vector<64x16xbf16>, vector<16x16xbf16>, vector<64x16xf32> -> vector<64x16xf32>
    %16 = arith.truncf %15 : vector<64x16xf32> to vector<64x16xbf16>
    %17 = vector.shape_cast %16 : vector<64x16xbf16> to vector<4x16x16xbf16>
    %cst_11 = arith.constant 0.000000e+00 : f32
    %18 = vector.broadcast %cst_11 : f32 to vector<16x16xf32>
    %19 = vector.extract_strided_slice %17 {offsets = [0, 0, 0], sizes = [1, 16, 16], strides = [1, 1, 1]} : vector<4x16x16xbf16> to vector<1x16x16xbf16>
    %20 = vector.shape_cast %19 : vector<1x16x16xbf16> to vector<16x16xbf16>
    %cst_12 = arith.constant dense<0.000000e+00> : vector<16x16xf32>
    %21 = tpu.matmul %0, %20, %cst_12 {dimension_numbers = #tpu.dot_dimension_numbers<[1], [0], [0], [1], [0, 0, 1, 1], [], []>} : vector<16x16xbf16>, vector<16x16xbf16>, vector<16x16xf32> -> vector<16x16xf32>
    %22 = vector.extract_strided_slice %4 {offsets = [0, 0, 0], sizes = [1, 16, 16], strides = [1, 1, 1]} : vector<4x16x16xf32> to vector<1x16x16xf32>
    %23 = vector.shape_cast %22 : vector<1x16x16xf32> to vector<16x16xf32>
    %24 = arith.subf %23, %21 : vector<16x16xf32>
    %25 = arith.mulf %24, %24 : vector<16x16xf32>
    %cst_13 = arith.constant 9.99999997E-7 : f32
    %26 = vector.broadcast %cst_13 : f32 to vector<16x16xf32>
    %27 = arith.addf %25, %26 : vector<16x16xf32>
    %28 = math.sqrt %27 : vector<16x16xf32>
    %29 = arith.addf %18, %28 : vector<16x16xf32>
    %30 = vector.extract_strided_slice %17 {offsets = [1, 0, 0], sizes = [1, 16, 16], strides = [1, 1, 1]} : vector<4x16x16xbf16> to vector<1x16x16xbf16>
    %31 = vector.shape_cast %30 : vector<1x16x16xbf16> to vector<16x16xbf16>
    %cst_14 = arith.constant dense<0.000000e+00> : vector<16x16xf32>
    %32 = tpu.matmul %0, %31, %cst_14 {dimension_numbers = #tpu.dot_dimension_numbers<[1], [0], [0], [1], [0, 0, 1, 1], [], []>} : vector<16x16xbf16>, vector<16x16xbf16>, vector<16x16xf32> -> vector<16x16xf32>
    %33 = vector.extract_strided_slice %4 {offsets = [1, 0, 0], sizes = [1, 16, 16], strides = [1, 1, 1]} : vector<4x16x16xf32> to vector<1x16x16xf32>
    %34 = vector.shape_cast %33 : vector<1x16x16xf32> to vector<16x16xf32>
    %35 = arith.subf %34, %32 : vector<16x16xf32>
    %36 = arith.mulf %35, %35 : vector<16x16xf32>
    %cst_15 = arith.constant 9.99999997E-7 : f32
    %37 = vector.broadcast %cst_15 : f32 to vector<16x16xf32>
    %38 = arith.addf %36, %37 : vector<16x16xf32>
    %39 = math.sqrt %38 : vector<16x16xf32>
    %40 = arith.addf %29, %39 : vector<16x16xf32>
    %41 = vector.extract_strided_slice %17 {offsets = [2, 0, 0], sizes = [1, 16, 16], strides = [1, 1, 1]} : vector<4x16x16xbf16> to vector<1x16x16xbf16>
    %42 = vector.shape_cast %41 : vector<1x16x16xbf16> to vector<16x16xbf16>
    %cst_16 = arith.constant dense<0.000000e+00> : vector<16x16xf32>
    %43 = tpu.matmul %0, %42, %cst_16 {dimension_numbers = #tpu.dot_dimension_numbers<[1], [0], [0], [1], [0, 0, 1, 1], [], []>} : vector<16x16xbf16>, vector<16x16xbf16>, vector<16x16xf32> -> vector<16x16xf32>
    %44 = vector.extract_strided_slice %4 {offsets = [2, 0, 0], sizes = [1, 16, 16], strides = [1, 1, 1]} : vector<4x16x16xf32> to vector<1x16x16xf32>
    %45 = vector.shape_cast %44 : vector<1x16x16xf32> to vector<16x16xf32>
    %46 = arith.subf %45, %43 : vector<16x16xf32>
    %47 = arith.mulf %46, %46 : vector<16x16xf32>
    %cst_17 = arith.constant 9.99999997E-7 : f32
    %48 = vector.broadcast %cst_17 : f32 to vector<16x16xf32>
    %49 = arith.addf %47, %48 : vector<16x16xf32>
    %50 = math.sqrt %49 : vector<16x16xf32>
    %51 = arith.addf %40, %50 : vector<16x16xf32>
    %52 = vector.extract_strided_slice %17 {offsets = [3, 0, 0], sizes = [1, 16, 16], strides = [1, 1, 1]} : vector<4x16x16xbf16> to vector<1x16x16xbf16>
    %53 = vector.shape_cast %52 : vector<1x16x16xbf16> to vector<16x16xbf16>
    %cst_18 = arith.constant dense<0.000000e+00> : vector<16x16xf32>
    %54 = tpu.matmul %0, %53, %cst_18 {dimension_numbers = #tpu.dot_dimension_numbers<[1], [0], [0], [1], [0, 0, 1, 1], [], []>} : vector<16x16xbf16>, vector<16x16xbf16>, vector<16x16xf32> -> vector<16x16xf32>
    %55 = vector.extract_strided_slice %4 {offsets = [3, 0, 0], sizes = [1, 16, 16], strides = [1, 1, 1]} : vector<4x16x16xf32> to vector<1x16x16xf32>
    %56 = vector.shape_cast %55 : vector<1x16x16xf32> to vector<16x16xf32>
    %57 = arith.subf %56, %54 : vector<16x16xf32>
    %58 = arith.mulf %57, %57 : vector<16x16xf32>
    %cst_19 = arith.constant 9.99999997E-7 : f32
    %59 = vector.broadcast %cst_19 : f32 to vector<16x16xf32>
    %60 = arith.addf %58, %59 : vector<16x16xf32>
    %61 = math.sqrt %60 : vector<16x16xf32>
    %62 = arith.addf %51, %61 : vector<16x16xf32>
    %63 = vector.shape_cast %62 : vector<16x16xf32> to vector<1x16x16xf32>
    %cst_20 = arith.constant dense<0.000000e+00> : vector<1xf32>
    %64 = vector.multi_reduction <add>, %63, %cst_20 [1, 2] : vector<1x16x16xf32> to vector<1xf32>
    %65 = vector.shape_cast %64 : vector<1xf32> to vector<1x1x1xf32>
    %66 = vector.extract %65[0, 0, 0] : f32 from vector<1x1x1xf32>
    %67 = vector.broadcast %12 : f32 to vector<1x8x128xf32>
    %c0_21 = arith.constant 0 : index
    %c0_22 = arith.constant 0 : index
    %c0_23 = arith.constant 0 : index
    %68 = vector.load %arg5[%c0_21, %c0_22, %c0_23] : memref<1x8x128xf32, #tpu.memory_space<vmem>>, vector<1x8x128xf32>
    tpu.vector_store %arg5[%c0_21, %c0_22, %c0_23], %67 {strides = array<i32>} : memref<1x8x128xf32, #tpu.memory_space<vmem>>, vector<1x8x128xf32>,
    %69 = vector.broadcast %66 : f32 to vector<1x8x128xf32>
    %c0_24 = arith.constant 0 : index
    %c0_25 = arith.constant 0 : index
    %c0_26 = arith.constant 0 : index
    %70 = vector.load %arg6[%c0_24, %c0_25, %c0_26] : memref<1x8x128xf32, #tpu.memory_space<vmem>>, vector<1x8x128xf32>
    tpu.vector_store %arg6[%c0_24, %c0_25, %c0_26], %69 {strides = array<i32>} : memref<1x8x128xf32, #tpu.memory_space<vmem>>, vector<1x8x128xf32>,
    return
  }
  func.func @transform_0(%arg0: i32) -> (i32, i32, i32) {
    %c0_i32 = arith.constant 0 : i32
    %c0_i32_0 = arith.constant 0 : i32
    %c0_i32_1 = arith.constant 0 : i32
    return %arg0, %c0_i32, %c0_i32_0 : i32, i32, i32
  }
  func.func @transform_1(%arg0: i32) -> (i32, i32, i32) {
    %c0_i32 = arith.constant 0 : i32
    %c0_i32_0 = arith.constant 0 : i32
    %c0_i32_1 = arith.constant 0 : i32
    return %arg0, %c0_i32, %c0_i32_0 : i32, i32, i32
  }
  func.func @transform_2(%arg0: i32) -> (i32, i32) {
    %c0_i32 = arith.constant 0 : i32
    %c0_i32_0 = arith.constant 0 : i32
    %c0_i32_1 = arith.constant 0 : i32
    return %c0_i32, %c0_i32_0 : i32, i32
  }
  func.func @transform_3(%arg0: i32) -> (i32, i32) {
    %c0_i32 = arith.constant 0 : i32
    %c0_i32_0 = arith.constant 0 : i32
    %c0_i32_1 = arith.constant 0 : i32
    return %c0_i32, %c0_i32_0 : i32, i32
  }
  func.func @transform_4(%arg0: i32) -> (i32, i32, i32) {
    %c0_i32 = arith.constant 0 : i32
    %c0_i32_0 = arith.constant 0 : i32
    %c0_i32_1 = arith.constant 0 : i32
    return %arg0, %c0_i32, %c0_i32_0 : i32, i32, i32
  }
  func.func @transform_5(%arg0: i32) -> (i32, i32, i32) {
    %c0_i32 = arith.constant 0 : i32
    %c0_i32_0 = arith.constant 0 : i32
    %c0_i32_1 = arith.constant 0 : i32
    return %arg0, %c0_i32, %c0_i32_0 : i32, i32, i32
  }
}

</mosaic_0001>

<bundles_post_ra>
// kernel: weighted_loss.1
= control target key start
LH: loop header
LB: loop body
LE: loop exit
PB: predicated region body
PF: predicated region fallthrough
CT: control target
= control target key end

     0   :  { %s1740_s0 = inlined_call_operand.hbm [shape: f32[8,16,16], index: 0, kind: input, shape index: {}]   ;;  %s1741_s1 = inlined_call_operand.hbm [shape: f32[8,16,16], index: 1, kind: input, shape index: {}]   ;;  %s1742_s2 = inlined_call_operand.hbm [shape: bf16[16,16], index: 2, kind: input, shape index: {}]   ;;  %s1743_s3 = inlined_call_operand.hbm [shape: bf16[16,16], index: 3, kind: input, shape index: {}]   ;;  %s1744_s4 = inlined_call_operand.vmem [shape: f32[2,8,128], index: 4, kind: output, shape index: {0}]   ;;  %s1745_s5 = inlined_call_operand.vmem [shape: f32[2,8,128], index: 5, kind: output, shape index: {1}]  }
   0x1   :  { %1746 = sst [smem:[#allocation13_spill]] %s1740_s0 }
   0x2   :  { %11 = vsyncpa [#allocation3], 0 }
   0x3   :  { %13 = vsyncpa [#allocation3 + $0x1], 0 }
   0x4   :  { %14 = vsyncpa [#allocation5], 0 }
   0x5   :  { %16 = vsyncpa [#allocation5 + $0x1], 0 }
   0x6   :  { %17 = vsyncpa [#allocation8], 0  ;;  %s1309_s18 = smov 0   ;;  %s1311_s19 = smov 0  }
   0x7   :  { %s1313_s20 = smov 0   ;;  %s1315_s21 = smov 0  }
   0x8 LB: > { %s1328_s22 = sadd.s32 4294967295, %s1271_s21   ;;  %p43_p0 = scmp.ne.s32.totalorder %s1263_s19, %s1259_s18  ;;  %s1271_s21 = sphi %s1315_s21, %s1754_s21   ;;  %s1267_s20 = sphi %s1313_s20, %s1753_s20   ;;  %s1263_s19 = sphi %s1311_s19, %s1752_s19   ;;  %s1259_s18 = sphi %s1309_s18, %s1751_s18  }
   0x9   : > { %p44_p1 = scmp.eq.s32.totalorder %s1328_s22, 0  ;;  %p955_p2 = scmp.ge.s32.totalorder %s1271_s21, 1 }
   0xa   : > { %p174_p3 = scmp.lt.s32.totalorder %s1271_s21, 3  ;;  %s185_s26 = sshll.u32 %s1742_s2, 4  ;;  %s186_s26 = int_to_ptr.hbm [resolvable:$true] %s185_s26 }
   0xb   : > { %p1336_p4 = por %p44_p1, %p43_p0  ;;  %s1273_s28 = smov [#allocation6]  }
   0xc   : > { %p1343_p5 = pnand %p955_p2, %p174_p3  ;;  %s187_s29 = sshll.u32 %s1273_s28, 4  ;;  %s188_s29 = int_to_ptr.vmem [resolvable:$true] %s187_s29 }
   0xd   : > { %s199_s7 = sshll.u32 %s1743_s3, 4  ;;  %s1274_s8 = smov 64   ;;  %s200_s7 = int_to_ptr.hbm [resolvable:$true] %s199_s7 }
   0xe   : > { %p1016_p6 = pneg %p1343_p5  ;;  %s1275_s9 = smov 4  }
   0xf   : > { %s1276_s10 = smov [#allocation7]   ;;  %s1355_s12 = sadd.s32 1, %s1271_s21  }
  0x10   : > { %p1017_p7 = pnand %p1016_p6, %p44_p1  ;;  %s201_s11 = sshll.u32 %s1276_s10, 4  ;;  %s202_s11 = int_to_ptr.vmem [resolvable:$true] %s201_s11 }
  0x11   : > { %s30_s13 = sadd.s32 1, %s1267_s20  ;;  %s27_s14 = ssub.s32 %s1271_s21, %s1355_s12 }
  0x12   : > { %1019 = dma.hbm_to_vmem [thread:$0]  (!%p1017_p7), %s186_s26, 128, %s188_s29, [#allocation5], %s1274_s8, %s1274_s8, %s1275_s9  }
  0x13   : > { %1022 = dma.hbm_to_vmem [thread:$0]  (!%p1017_p7), %s200_s7, 128, %s202_s11, [#allocation8], %s1274_s8, %s1274_s8, %s1275_s9  }
  0x14   : > { %p37_p8 = scmp.ne.s32.totalorder %s1267_s20, %s1263_s19  ;;  %p28_p9 = scmp.eq.s32.totalorder %s27_s14, 0 }
  0x15   : > { %p38_p10 = scmp.eq.s32.totalorder %s1271_s21, 0  ;;  %p1032_p11 = scmp.lt.s32.totalorder %s1271_s21, 2 }
  0x16   : > { %s215_s15 = sand.u32 1, %s1267_s20   ;;  %s993_s18 = sshll.u32 %s1271_s21, 6 }
  0x17   : > { %s1366_s16 = scalar_select %p28_p9, %s1267_s20, %s30_s13  }
  0x18   : > { %p39_p12 = por %p38_p10, %p37_p8  ;;  %s1368_s17 = sshll.u32 %s215_s15, 6 }
  0x19   : > { %s1749_s0 = sld [smem:[#allocation13_spill]]  ;;  %s219_s29 = scalar_lea.vmem [#allocation2], %s1368_s17 }
  0x1a   : > { %s228_s30 = sshll.u32 %s219_s29, 4  ;;  %p1375_p13 = pnand %p1032_p11, %p39_p12  ;;  %s229_s30 = int_to_ptr.vmem [resolvable:$true] %s228_s30 }
  0x1b   : > { %s248_s9 = scalar_lea.hbm %s1741_s1, %s993_s18  ;;  %s216_s10 = scalar_lea.sflag [#allocation3], %s215_s15 }
  0x1c   : > { %p1169_p2 = pneg %p1375_p13 }
  0x1f   : > { %s225_s26 = scalar_lea.hbm %s1749_s0, %s993_s18  ;;  %s1172_s25 = scalar_lea.hbm %s1749_s0, 128 }
  0x20   : > { %s226_s28 = sshll.u32 %s225_s26, 4  ;;  %s227_s28 = int_to_ptr.hbm [resolvable:$true] %s226_s28 }
  0x21   : > { %s1165_s11 = sshra.s32 %s227_s28, 4  ;;  %s1166_s11 = int_to_ptr.hbm [resolvable:$true] %s1165_s11 }
  0x22   : > { %s1167_s13 = scalar_lea.hbm %s1166_s11, 64  ;;  %p1173_p7 = scmp.lt.s32.totalorder %s1166_s11, %s1749_s0 }
  0x23   : > { %p1168_p0 = scmp.ne.s32.totalorder %s1166_s11, %s1167_s13  ;;  %p1174_p8 = scmp.lt.s32.totalorder %s1172_s25, %s1167_s13 }
  0x25   : > { %p1170_p3 = pnand %p1169_p2, %p1168_p0  ;;  %p1175_p9 = por %p1174_p8, %p1173_p7 }
  0x27   : > { %p1171_p6 = pneg %p1170_p3 }
  0x29   : > { %p1176_p10 = pnand %p1175_p9, %p1171_p6 }
  0x2b   : > { %1179 = shalt.err (!%p1176_p10)
}
  0x2c   : > { %s1277_s15 = smov 128   ;;  %s1278_s18 = smov 8  }
  0x2d   : > { %1026 = dma.hbm_to_vmem [thread:$0]  (!%p1375_p13), %s227_s28, 1024, %s229_s30, %s216_s10, %s1277_s15, %s1277_s15, %s1278_s18  }
  0x2e   : > { %s249_s7 = sshll.u32 %s248_s9, 4  ;;  %s242_s8 = scalar_lea.vmem [#allocation4], %s1368_s17  ;;  %s250_s7 = int_to_ptr.hbm [resolvable:$true] %s249_s7 }
  0x2f   : > { %s251_s14 = sshll.u32 %s242_s8, 4  ;;  %s238_s24 = sand.u32 1, %s1271_s21   ;;  %s252_s14 = int_to_ptr.vmem [resolvable:$true] %s251_s14 }
  0x30   : > { %s239_s26 = scalar_lea.sflag [#allocation5], %s238_s24  ;;  %s1195_s11 = sshra.s32 %s250_s7, 4  ;;  %s1196_s11 = int_to_ptr.hbm [resolvable:$true] %s1195_s11 }
  0x31   : > { %s1197_s13 = scalar_lea.hbm %s1196_s11, 64  ;;  %s1202_s0 = scalar_lea.hbm %s1741_s1, 128 }
  0x32   : > { %p1198_p11 = scmp.ne.s32.totalorder %s1196_s11, %s1197_s13  ;;  %p1203_p3 = scmp.lt.s32.totalorder %s1196_s11, %s1741_s1 }
  0x33   : > { %p1204_p6 = scmp.lt.s32.totalorder %s1202_s0, %s1197_s13 }
  0x34   : > { %p1200_p12 = pnand %p1198_p11, %p1169_p2 }
  0x35   : > { %p1205_p7 = por %p1204_p6, %p1203_p3 }
  0x36   : > { %p1201_p0 = pneg %p1200_p12 }
  0x38   : > { %p1206_p8 = pnand %p1205_p7, %p1201_p0 }
  0x3a   : > { %1209 = shalt.err (!%p1206_p8)
}
  0x3b   : > { %1029 = dma.hbm_to_vmem [thread:$0]  (!%p1375_p13), %s250_s7, 1024, %s252_s14, %s239_s26, %s1277_s15, %s1277_s15, %s1278_s18  }
  0x3c   : > { %263 = sbr.rel (%p1343_p5) target bundleno = 599 (0x257), region = 36  ;;  %s265_s21 = sand.u32 (!%p1343_p5), 1, %s1263_s19  }
  0x3d   : > { %s968_s17 = sshll.u32 (!%p1343_p5), %s265_s21, 6  ;;  %s266_s9 = scalar_lea.sflag (!%p1343_p5), [#allocation3], %s265_s21 }
  0x3e   : > { %s1411_s10 = scalar_lea.vmem (!%p1343_p5), [#allocation2], %s968_s17 }
  0x41   : > { %1242 = dma.done.wait (%p1336_p4), %s266_s9, 1024  }
  0x42   : > { %1244 = vsyncadd (%p1336_p4), %s266_s9, 4294966272  ;;  %s275_s0 = sand.u32 1, %s1328_s22   ;;  %s1418_s15 = scalar_lea.vmem [#allocation4], %s968_s17 }
  0x43   : > { %s276_s6 = scalar_lea.sflag [#allocation5], %s275_s0 }
  0x44   : > { %1246 = dma.done.wait (%p1336_p4), %s276_s6, 1024  }
  0x45   : > { %1248 = vsyncadd (%p1336_p4), %s276_s6, 4294966272 }
  0x46   : > { %1250 = dma.done.wait (%p44_p1), [#allocation5], 128  }
  0x47   : > { %1252 = vsyncadd (%p44_p1), [#allocation5], 4294967168 }
  0x48   : > { %1254 = dma.done.wait (%p44_p1), [#allocation8], 128  }
  0x49   : > { %1256 = vsyncadd (%p44_p1), [#allocation8], 4294967168  ;;  %v997_v0 = vld [vmem:[#allocation7] sm:$0xff]  ;;  %v340_v1 = vld [vmem:[%s1411_s10] sm:$0xff]  ;;  %vm476_vm0 = vcmask 130048   ;;  %p327_p1 = scmp.lt.s32.totalorder %s1328_s22, 1 }
  0x4a   : > { %v341_v2 = vld [vmem:[%s1411_s10 + $0x8] sm:$0xff]  ;;  %v348_v3 = vld [vmem:[%s1418_s15] sm:$0xff]  ;;  %554 = vmatpush.bf16.msra.mxu0 %v997_v0  ;;  %998 = vmatpush.bf16.msra.mxu2 %v997_v0  ;;  %v346_v15 = vld [vmem:[%s1411_s10 + $0x30] sm:$0xff] }
  0x4b   : > { %v349_v4 = vld [vmem:[%s1418_s15 + $0x8] sm:$0xff]  ;;  %v344_v5 = vld [vmem:[%s1411_s10 + $0x20] sm:$0xff]  ;;  %v1437_v6 = vsub.f32 %v340_v1, %v348_v3  ;;  %999 = vmatpush.bf16.msra.mxu3 %v997_v0  ;;  %v347_v18 = vld [vmem:[%s1411_s10 + $0x38] sm:$0xff]  ;;  %s1756_s22 = smov (!%p327_p1, %s1328_s22), 1 }
  0x4c   : > { %v1439_v7 = vsub.f32 %v341_v2, %v349_v4  ;;  %v345_v8 = vld [vmem:[%s1411_s10 + $0x28] sm:$0xff]  ;;  %v352_v9 = vld [vmem:[%s1418_s15 + $0x20] sm:$0xff]  ;;  %v354_v19 = vld [vmem:[%s1418_s15 + $0x30] sm:$0xff]  ;;  %s972_s23 = sshll.u32 %s1756_s22, 3 }
  0x4d   : > { %v353_v10 = vld [vmem:[%s1418_s15 + $0x28] sm:$0xff]  ;;  %v1444_v11 = vsub.f32 %v344_v5, %v352_v9  ;;  %v501_v13 = vpack.c.bf16 %v1437_v6, %v1437_v6  ;;  %v355_v20 = vld [vmem:[%s1418_s15 + $0x38] sm:$0xff]  ;;  %v342_v23 = vld [vmem:[%s1411_s10 + $0x10] sm:$0xff]  ;;  %v1464_v30 = vsub.f32 %v346_v15, %v354_v19  ;;  %s330_s7 = scalar_lea.vmem %s1744_s4, %s972_s23  ;;  %s334_s26 = scalar_lea.vmem %s1745_s5, %s972_s23 }
  0x4e   : > { %v1446_v12 = vsub.f32 %v345_v8, %v353_v10  ;;  %v502_v14 = vpack.c.bf16 %v1439_v7, %v1439_v7  ;;  %v343_v26 = vld [vmem:[%s1411_s10 + $0x18] sm:$0xff]  ;;  %v350_v27 = vld [vmem:[%s1418_s15 + $0x10] sm:$0xff]  ;;  %v1466_v31 = vsub.f32 %v347_v18, %v355_v20  ;;  %v996_v55 = vld [vmem:[#allocation6] sm:$0xff]  ;;  %v365_v15 = vmul.f32 %v1439_v7, %v1439_v7 }
  0x4f   : > { %v505_v16 = vpack.c.bf16 %v1444_v11, %v1444_v11  ;;  %v517_v21 = vunpack.c.l.b16 %v501_v13  ;;  %v351_v28 = vld [vmem:[%s1418_s15 + $0x18] sm:$0xff]  ;;  %v507_v33 = vpack.c.bf16 %v1464_v30, %v1464_v30  ;;  %v1473_v35 = vsub.f32 %v342_v23, %v350_v27 }
  0x50   : > { %v506_v17 = vpack.c.bf16 %v1446_v12, %v1446_v12  ;;  %v518_v22 = vunpack.c.l.b16 %v502_v14  ;;  %v508_v34 = vpack.c.bf16 %v1466_v31, %v1466_v31  ;;  %v1475_v36 = vsub.f32 %v343_v26, %v351_v28 }
  0x51   : > { %v521_v24 = vunpack.c.l.b16 %v505_v16  ;;  %v523_v37 = vunpack.c.l.b16 %v507_v33  ;;  %v503_v40 = vpack.c.bf16 %v1473_v35, %v1473_v35  ;;  %v364_v14 = vmul.f32 %v1437_v6, %v1437_v6 }
  0x52   : > { %v522_v25 = vunpack.c.l.b16 %v506_v17  ;;  %v525_v29 = vpack.c.b16 %v518_v22, %v517_v21  ;;  %v524_v38 = vunpack.c.l.b16 %v508_v34  ;;  %v504_v41 = vpack.c.bf16 %v1475_v36, %v1475_v36 }
  0x53   : > { %v519_v42 = vunpack.c.l.b16 %v503_v40  ;;  %v366_v16 = vmul.f32 %v1473_v35, %v1473_v35  ;;  %v1494_v17 = vadd.f32 1e-06, %v364_v14  ;;  %v367_v18 = vmul.f32 %v1475_v36, %v1475_v36 }
  0x54   : > { %v527_v32 = vpack.c.b16 %v522_v25, %v521_v24  ;;  %978 = vmatmul.msk.bf16.vlgmr.msra.gmra.mxu0 %vm476_vm0, %v525_v29  ;;  %v528_v39 = vpack.c.b16 %v524_v38, %v523_v37  ;;  %v520_v43 = vunpack.c.l.b16 %v504_v41  ;;  %v1498_v19 = vadd.f32 1e-06, %v365_v15 }
  0x55   : > { %v368_v20 = vmul.f32 %v1444_v11, %v1444_v11  ;;  %v1502_v21 = vadd.f32 1e-06, %v366_v16  ;;  %v1504_v22 = vadd.f32 1e-06, %v367_v18  ;;  %1073 = vrsqrt.f32 %v1494_v17 }
  0x56   : > { %980 = vmatmul.msk.bf16.vlgmr.msra.gmra.mxu2 %vm476_vm0, %v527_v32  ;;  %981 = vmatmul.msk.bf16.vlgmr.msra.gmra.mxu3 %vm476_vm0, %v528_v39  ;;  %v526_v44 = vpack.c.b16 %v520_v43, %v519_v42  ;;  %1075 = vrsqrt.f32 %v1498_v19  ;;  %v369_v24 = vmul.f32 %v1446_v12, %v1446_v12  ;;  %v370_v26 = vmul.f32 %v1464_v30, %v1464_v30 }
  0x57   : > { %v1508_v23 = vadd.f32 1e-06, %v368_v20  ;;  %1077 = vrsqrt.f32 %v1502_v21  ;;  %v371_v33 = vmul.f32 %v1466_v31, %v1466_v31  ;;  %vm387_vm1 = vcmp.eq.f32.partialorder %v1494_v17, inf }
  0x58   : > { %1079 = vrsqrt.f32 %v1504_v22  ;;  %v1518_v32 = vadd.f32 1e-06, %v369_v24  ;;  %v1524_v40 = vadd.f32 1e-06, %v370_v26  ;;  %vm399_vm2 = vcmp.eq.f32.partialorder %v1498_v19, inf }
  0x59   : > { %1081 = vrsqrt.f32 %v1508_v23  ;;  %vm389_vm3 = vcmp.eq.f32.partialorder %v1494_v17, 0.0  ;;  %vm401_vm4 = vcmp.eq.f32.partialorder %v1498_v19, 0.0  ;;  %vm411_vm5 = vcmp.eq.f32.partialorder %v1502_v21, inf }
  0x5a   : > { %1083 = vrsqrt.f32 %v1518_v32  ;;  %vm413_vm6 = vcmp.eq.f32.partialorder %v1502_v21, 0.0  ;;  %vm423_vm7 = vcmp.eq.f32.partialorder %v1504_v22, inf  ;;  %vm425_vm8 = vcmp.eq.f32.partialorder %v1504_v22, 0.0 }
  0x5b   : > { %v1074_v25 = vpop.eup %1073  ;;  %1085 = vrsqrt.f32 %v1524_v40  ;;  %v426_v26 = vand.u32 2147483648, %v1504_v22  ;;  %vm435_vm9 = vcmp.eq.f32.partialorder %v1508_v23, inf  ;;  %vm437_vm10 = vcmp.eq.f32.partialorder %v1508_v23, 0.0 }
  0x5c   : > { %v1076_v27 = vpop.eup %1075  ;;  %v381_v28 = vmul.f32 %v1074_v25, %v1494_v17  ;;  %vm447_vm11 = vcmp.eq.f32.partialorder %v1518_v32, inf  ;;  %vm449_vm12 = vcmp.eq.f32.partialorder %v1518_v32, 0.0  ;;  %vm459_vm13 = vcmp.eq.f32.partialorder %v1524_v40, inf }
  0x5d   : > { %v1078_v29 = vpop.eup %1077  ;;  %v393_v34 = vmul.f32 %v1076_v27, %v1498_v19  ;;  %vm461_vm14 = vcmp.eq.f32.partialorder %v1524_v40, 0.0 }
  0x5e   : > { %v382_v37 = vmul.f32 %v1074_v25, %v381_v28  ;;  %v405_v38 = vmul.f32 %v1078_v29, %v1502_v21  ;;  %v1080_v39 = vpop.eup %1079 }
  0x5f   : > { %v394_v41 = vmul.f32 %v1076_v27, %v393_v34 }
  0x60   : > { %v383_v42 = vmul.f32 0.5, %v382_v37  ;;  %v406_v43 = vmul.f32 %v1078_v29, %v405_v38 }
  0x64   : > { %979 = vmatmul.msk.bf16.gmra.mxu0 %vm476_vm0, %v526_v44  ;;  %v417_v44 = vmul.f32 %v1080_v39, %v1504_v22 }
  0xd1   : > { %v556_v45 = vpop.f32.mrf.mxu0 }
  0xd2   : > { %v576_v46 = vpack.c.bf16 %v556_v45, %v556_v45  ;;  %v1527_v45 = vpop.eup %1081 }
  0xd4   : > { %v591_v50 = vunpack.c.l.b16 %v576_v46  ;;  %v1529_v46 = vadd.f32 1e-06, %v371_v33  ;;  %v438_v33 = vand.u32 2147483648, %v1508_v23 }
  0xd6   : > { %1087 = vrsqrt.f32 %v1529_v46  ;;  %vm471_vm15 = vcmp.eq.f32.partialorder %v1529_v46, inf }
  0xd9   : > { %v566_v47 = vpop.f32.mrf.mxu2  ;;  %v558_v48 = vpop.f32.mrf.mxu0 }
  0xda   : > { %v577_v49 = vpack.c.bf16 %v558_v48, %v558_v48  ;;  %v580_v52 = vpack.c.bf16 %v566_v47, %v566_v47  ;;  %v571_v53 = vpop.f32.mrf.mxu3  ;;  %v395_v47 = vmul.f32 0.5, %v394_v41  ;;  %v384_v48 = vsub.f32 1.5, %v383_v42 }
  0xdb   : > { %v582_v60 = vpack.c.bf16 %v571_v53, %v571_v53  ;;  %v429_v53 = vmul.f32 %v1527_v45, %v1508_v23 }
  0xdc   : > { %v592_v51 = vunpack.c.l.b16 %v577_v49  ;;  %v698_v57 = vunpack.c.l.b16 %v580_v52  ;;  %v407_v49 = vmul.f32 0.5, %v406_v43  ;;  %v396_v52 = vsub.f32 1.5, %v395_v47 }
  0xdd   : > { %v750_v0 = vunpack.c.l.b16 %v582_v60  ;;  %v450_v47 = vand.u32 2147483648, %v1518_v32 }
  0xde   : > { %v593_v54 = vpack.c.b16 %v592_v51, %v591_v50  ;;  %v418_v50 = vmul.f32 %v1080_v39, %v417_v44 }
  0xe0   : > { %605 = vmatpush.bf16.msra.mxu1 %v593_v54 }
  0xe1   : > { %v568_v56 = vpop.f32.mrf.mxu2  ;;  %v561_v59 = vpop.f32.mrf.mxu0 }
  0xe2   : > { %v581_v58 = vpack.c.bf16 %v568_v56, %v568_v56  ;;  %v573_v63 = vpop.f32.mrf.mxu3  ;;  %v578_v2 = vpack.c.bf16 %v561_v59, %v561_v59  ;;  %v408_v56 = vsub.f32 1.5, %v407_v49 }
  0xe3   : > { %986 = vmatmul.msk.bf16.vlgmr.msra.gmra.mxu1 %vm476_vm0, %v996_v55  ;;  %v583_v1 = vpack.c.bf16 %v573_v63, %v573_v63  ;;  %v1084_v63 = vpop.eup %1083 }
  0xe4   : > { %v699_v61 = vunpack.c.l.b16 %v581_v58  ;;  %v646_v9 = vunpack.c.l.b16 %v578_v2  ;;  %v397_v58 = vmul.f32 %v1076_v27, %v396_v52 }
  0xe5   : > { %v751_v3 = vunpack.c.l.b16 %v583_v1 }
  0xe6   : > { %v700_v62 = vpack.c.b16 %v699_v61, %v698_v57  ;;  %v419_v57 = vmul.f32 0.5, %v418_v50  ;;  %v409_v61 = vmul.f32 %v1078_v29, %v408_v56  ;;  %v398_v1 = vmul.f32 %v397_v58, %v1498_v19 }
  0xe7   : > { %v752_v8 = vpack.c.b16 %v751_v3, %v750_v0  ;;  %v390_v0 = vand.u32 2147483648, %v1494_v17  ;;  %v430_v3 = vmul.f32 %v1527_v45, %v429_v53 }
  0xe8   : > { %709 = vmatpush.bf16.msrb.mxu3 %v700_v62  ;;  %v420_v62 = vsub.f32 1.5, %v419_v57 }
  0xe9   : > { %v563_v4 = vpop.f32.mrf.mxu0  ;;  %761 = vmatpush.bf16.msrb.mxu1 %v752_v8  ;;  %v402_v8 = vand.u32 2147483648, %v1498_v19  ;;  %v431_v27 = vmul.f32 0.5, %v430_v3 }
  0xea   : > { %v579_v5 = vpack.c.bf16 %v563_v4, %v563_v4  ;;  %v1547_v4 = vpop.eup %1085  ;;  %v421_v18 = vmul.f32 %v1080_v39, %v420_v62 }
  0xeb   : > { %988 = vmatmul.msk.bf16.vlgmr.msrb.gmra.mxu3 %vm476_vm0, %v996_v55  ;;  %v1557_v14 = vpop.eup %1087  ;;  %v453_v39 = vmul.f32 %v1547_v4, %v1524_v40 }
  0xec   : > { %v647_v10 = vunpack.c.l.b16 %v579_v5  ;;  %v400_v5 = vsel %vm399_vm2, %v1498_v19, %v398_v1 }
  0xed   : > { %v403_v20 = vsel %vm401_vm4, %v402_v8, %v400_v5  ;;  %v454_v49 = vmul.f32 %v1547_v4, %v453_v39 }
  0xee   : > { %v648_v13 = vpack.c.b16 %v647_v10, %v646_v9  ;;  %v410_v9 = vmul.f32 %v409_v61, %v1502_v21  ;;  %v414_v10 = vand.u32 2147483648, %v1502_v21 }
  0xef   : > { %v455_v53 = vmul.f32 0.5, %v454_v49 }
  0xf0   : > { %657 = vmatpush.bf16.msrb.mxu2 %v648_v13  ;;  %v441_v13 = vmul.f32 %v1084_v63, %v1518_v32 }
  0xf3   : > { %987 = vmatmul.msk.bf16.vlgmr.msrb.gmra.mxu2 %vm476_vm0, %v996_v55  ;;  %989 = vmatmul.msk.bf16.vlgmr.msrb.gmra.mxu1 %vm476_vm0, %v996_v55  ;;  %v385_v55 = vmul.f32 %v1074_v25, %v384_v48  ;;  %v422_v25 = vmul.f32 %v421_v18, %v1504_v22 }
  0xf5   : > { %v386_v60 = vmul.f32 %v385_v55, %v1494_v17  ;;  %v424_v29 = vsel %vm423_vm7, %v1504_v22, %v422_v25  ;;  %v465_v22 = vmul.f32 %v1557_v14, %v1529_v46 }
  0xf6   : > { %v427_v43 = vsel %vm425_vm8, %v426_v26, %v424_v29 }
  0xf7   : > { %v388_v2 = vsel %vm387_vm1, %v1494_v17, %v386_v60  ;;  %v412_v17 = vsel %vm411_vm5, %v1502_v21, %v410_v9  ;;  %v442_v21 = vmul.f32 %v1084_v63, %v441_v13  ;;  %v466_v57 = vmul.f32 %v1557_v14, %v465_v22 }
  0xf8   : > { %v391_v16 = vsel %vm389_vm3, %v390_v0, %v388_v2  ;;  %v415_v24 = vsel %vm413_vm6, %v414_v10, %v412_v17  ;;  %vm473_vm1 = vcmp.eq.f32.partialorder %v1529_v46, 0.0  ;;  %v482_v25 = vsel %vm476_vm0, %v427_v43, 0.0 }
  0xf9   : > { %v443_v38 = vmul.f32 0.5, %v442_v21  ;;  %v467_v61 = vmul.f32 0.5, %v466_v57  ;;  %v477_v62 = vsel %vm476_vm0, %v391_v16, 0.0 }
  0xfb   : > { %v444_v48 = vsub.f32 1.5, %v443_v38  ;;  %v468_v13 = vsub.f32 1.5, %v467_v61 }
  0xfd   : > { %v445_v52 = vmul.f32 %v1084_v63, %v444_v48  ;;  %v478_v63 = vsel %vm476_vm0, %v403_v20, 0.0  ;;  %v469_v20 = vmul.f32 %v1557_v14, %v468_v13 }
  0xfe   : > { %v479_v5 = vadd.f32 %v478_v63, %v477_v62 }
  0xff   : > { %v446_v58 = vmul.f32 %v445_v52, %v1518_v32  ;;  %v470_v21 = vmul.f32 %v469_v20, %v1529_v46 }
 0x101   : > { %v448_v2 = vsel %vm447_vm11, %v1518_v32, %v446_v58  ;;  %v472_v38 = vsel %vm471_vm15, %v1529_v46, %v470_v21 }
 0x102   : > { %v451_v16 = vsel %vm449_vm12, %v450_v47, %v448_v2 }
 0x103   : > { %v486_v14 = vsel %vm476_vm0, %v451_v16, 0.0 }
 0x160   : > { %v607_v51 = vpop.f32.mrf.mxu1 }
 0x161   : > { %v612_v54 = vsub.f32 %v1437_v6, %v607_v51 }
 0x163   : > { %v614_v59 = vmul.f32 %v612_v54, %v612_v54  ;;  %v462_v54 = vand.u32 2147483648, %v1524_v40 }
 0x165   : > { %v1542_v6 = vadd.f32 1e-06, %v614_v59  ;;  %v456_v59 = vsub.f32 1.5, %v455_v53 }
 0x167   : > { %1089 = vrsqrt.f32 %v1542_v6  ;;  %v457_v3 = vmul.f32 %v1547_v4, %v456_v59  ;;  %vm625_vm2 = vcmp.eq.f32.partialorder %v1542_v6, inf  ;;  %vm627_vm3 = vcmp.eq.f32.partialorder %v1542_v6, 0.0 }
 0x168   : > { %v609_v15 = vpop.f32.mrf.mxu1 }
 0x169   : > { %v613_v19 = vsub.f32 %v1439_v7, %v609_v15  ;;  %v432_v7 = vsub.f32 1.5, %v431_v27  ;;  %v480_v15 = vsel %vm476_vm0, %v415_v24, 0.0  ;;  %v458_v17 = vmul.f32 %v457_v3, %v1524_v40 }
 0x16a   : > { %v481_v18 = vadd.f32 %v480_v15, %v479_v5 }
 0x16b   : > { %v615_v28 = vmul.f32 %v613_v19, %v613_v19  ;;  %v433_v44 = vmul.f32 %v1527_v45, %v432_v7 }
 0x16c   : > { %v483_v32 = vadd.f32 %v482_v25, %v481_v18 }
 0x16d   : > { %v1571_v34 = vadd.f32 1e-06, %v615_v28  ;;  %v1576_v41 = vpop.eup %1089 }
 0x16e   : > { %v711_v37 = vpop.f32.mrf.mxu3 }
 0x16f   : > { %v716_v42 = vsub.f32 %v1444_v11, %v711_v37  ;;  %1091 = vrsqrt.f32 %v1571_v34  ;;  %v434_v11 = vmul.f32 %v433_v44, %v1508_v23  ;;  %vm637_vm4 = vcmp.eq.f32.partialorder %v1571_v34, inf }
 0x170   : > { %v763_v51 = vpop.f32.mrf.mxu1  ;;  %vm639_vm7 = vcmp.eq.f32.partialorder %v1571_v34, 0.0 }
 0x171   : > { %v718_v50 = vmul.f32 %v716_v42, %v716_v42  ;;  %v768_v45 = vsub.f32 %v1464_v30, %v763_v51  ;;  %v436_v56 = vsel %vm435_vm9, %v1508_v23, %v434_v11  ;;  %v474_v30 = vand.u32 2147483648, %v1529_v46 }
 0x172   : > { %v439_v1 = vsel %vm437_vm10, %v438_v33, %v436_v56 }
 0x173   : > { %v1592_v55 = vadd.f32 1e-06, %v718_v50  ;;  %v770_v60 = vmul.f32 %v768_v45, %v768_v45  ;;  %v475_v42 = vsel %vm473_vm1, %v474_v30, %v472_v38 }
 0x174   : > { %v490_v47 = vsel %vm476_vm0, %v475_v42, 0.0 }
 0x175   : > { %v1610_v8 = vpop.eup %1091  ;;  %1093 = vrsqrt.f32 %v1592_v55  ;;  %v1632_v29 = vadd.f32 1e-06, %v770_v60  ;;  %vm729_vm8 = vcmp.eq.f32.partialorder %v1592_v55, inf  ;;  %vm731_vm9 = vcmp.eq.f32.partialorder %v1592_v55, 0.0 }
 0x176   : > { %v713_v0 = vpop.f32.mrf.mxu3  ;;  %v659_v10 = vpop.f32.mrf.mxu2  ;;  %v631_v51 = vmul.f32 %v1610_v8, %v1571_v34 }
 0x177   : > { %v717_v9 = vsub.f32 %v1446_v12, %v713_v0  ;;  %v664_v23 = vsub.f32 %v1473_v35, %v659_v10  ;;  %v484_v12 = vsel %vm476_vm0, %v439_v1, 0.0  ;;  %v460_v35 = vsel %vm459_vm13, %v1524_v40, %v458_v17 }
 0x178   : > { %v765_v19 = vpop.f32.mrf.mxu1  ;;  %v463_v28 = vsel %vm461_vm14, %v462_v54, %v460_v35  ;;  %v485_v33 = vadd.f32 %v484_v12, %v483_v32  ;;  %v619_v40 = vmul.f32 %v1576_v41, %v1542_v6  ;;  %v632_v52 = vmul.f32 %v1610_v8, %v631_v51 }
 0x179   : > { %v719_v4 = vmul.f32 %v717_v9, %v717_v9  ;;  %v666_v26 = vmul.f32 %v664_v23, %v664_v23  ;;  %v769_v27 = vsub.f32 %v1466_v31, %v765_v19  ;;  %v488_v39 = vsel %vm476_vm0, %v463_v28, 0.0 }
 0x17a   : > { %v487_v43 = vadd.f32 %v486_v14, %v485_v33  ;;  %v620_v48 = vmul.f32 %v1576_v41, %v619_v40  ;;  %v633_v60 = vmul.f32 0.5, %v632_v52  ;;  %vm781_vm13 = vcmp.eq.f32.partialorder %v1632_v29, inf }
 0x17b   : > { %v1626_v24 = vadd.f32 1e-06, %v719_v4  ;;  %v1634_v7 = vadd.f32 1e-06, %v666_v26  ;;  %v1094_v31 = vpop.eup %1093  ;;  %v771_v37 = vmul.f32 %v769_v27, %v769_v27  ;;  %vm783_vm1 = vcmp.eq.f32.partialorder %v1632_v29, 0.0 }
 0x17c   : > { %v489_v50 = vadd.f32 %v488_v39, %v487_v43  ;;  %v621_v46 = vmul.f32 0.5, %v620_v48  ;;  %v723_v53 = vmul.f32 %v1094_v31, %v1592_v55  ;;  %v634_v10 = vsub.f32 1.5, %v633_v60 }
 0x17d   : > { %1095 = vrsqrt.f32 %v1634_v7  ;;  %v1652_v11 = vadd.f32 1e-06, %v771_v37  ;;  %vm677_vm5 = vcmp.eq.f32.partialorder %v1634_v7, inf  ;;  %vm679_vm6 = vcmp.eq.f32.partialorder %v1634_v7, 0.0 }
 0x17e   : > { %1097 = vrsqrt.f32 %v1626_v24  ;;  %v661_v44 = vpop.f32.mrf.mxu2  ;;  %v491_v45 = vadd.f32 %v490_v47, %v489_v50  ;;  %v622_v57 = vsub.f32 1.5, %v621_v46  ;;  %v724_v59 = vmul.f32 %v1094_v31, %v723_v53 }
 0x17f   : > { %v665_v49 = vsub.f32 %v1475_v36, %v661_v44  ;;  %1099 = vrsqrt.f32 %v1632_v29  ;;  %v635_v26 = vmul.f32 %v1610_v8, %v634_v10  ;;  %v680_v32 = vand.u32 2147483648, %v1634_v7 }
 0x180   : > { %492 = vadd.xlane.f32.xlu0 %v491_v45  ;;  %1101 = vrsqrt.f32 %v1652_v11  ;;  %v725_v62 = vmul.f32 0.5, %v724_v59  ;;  %v623_v0 = vmul.f32 %v1576_v41, %v622_v57  ;;  %v628_v41 = vand.u32 2147483648, %v1542_v6 }
 0x181   : > { %v667_v22 = vmul.f32 %v665_v49, %v665_v49  ;;  %v636_v42 = vmul.f32 %v635_v26, %v1571_v34  ;;  %v640_v43 = vand.u32 2147483648, %v1571_v34  ;;  %vm741_vm12 = vcmp.eq.f32.partialorder %v1626_v24, inf }
 0x182   : > { %v726_v2 = vsub.f32 1.5, %v725_v62  ;;  %v624_v18 = vmul.f32 %v623_v0, %v1542_v6  ;;  %v784_v62 = vand.u32 2147483648, %v1632_v29  ;;  %vm793_vm14 = vcmp.eq.f32.partialorder %v1652_v11, inf }
 0x183   : > { %v1096_v54 = vpop.eup %1095  ;;  %v1656_v56 = vadd.f32 1e-06, %v667_v22  ;;  %v732_v22 = vand.u32 2147483648, %v1592_v55  ;;  %vm743_vm15 = vcmp.eq.f32.partialorder %v1626_v24, 0.0 }
 0x184   : > { %v1098_v36 = vpop.eup %1097  ;;  %v671_v58 = vmul.f32 %v1096_v54, %v1634_v7  ;;  %v727_v23 = vmul.f32 %v1094_v31, %v726_v2  ;;  %v626_v33 = vsel %vm625_vm2, %v1542_v6, %v624_v18  ;;  %v638_v6 = vsel %vm637_vm4, %v1571_v34, %v636_v42 }
 0x185   : > { %1103 = vrsqrt.f32 %v1656_v56  ;;  %v1100_v30 = vpop.eup %1099  ;;  %v735_v63 = vmul.f32 %v1098_v36, %v1626_v24  ;;  %v629_v47 = vsel %vm627_vm3, %v628_v41, %v626_v33  ;;  %vm689_vm10 = vcmp.eq.f32.partialorder %v1656_v56, inf }
 0x186   : > { %v672_v61 = vmul.f32 %v1096_v54, %v671_v58  ;;  %v775_v5 = vmul.f32 %v1100_v30, %v1632_v29  ;;  %v1102_v9 = vpop.eup %1101  ;;  %v728_v28 = vmul.f32 %v727_v23, %v1592_v55  ;;  %vm691_vm11 = vcmp.eq.f32.partialorder %v1656_v56, 0.0 }
 0x187   : > { %v736_v3 = vmul.f32 %v1098_v36, %v735_v63  ;;  %v787_v12 = vmul.f32 %v1102_v9, %v1652_v11  ;;  %v692_v53 = vand.u32 2147483648, %v1656_v56  ;;  %v641_v60 = vsel %vm639_vm7, %v640_v43, %v638_v6 }
 0x188   : > { %v673_v1 = vmul.f32 0.5, %v672_v61  ;;  %v776_v17 = vmul.f32 %v1100_v30, %v775_v5  ;;  %v730_v48 = vsel %vm729_vm8, %v1592_v55, %v728_v28  ;;  %vm795_vm2 = vcmp.eq.f32.partialorder %v1652_v11, 0.0 }
 0x189   : > { %v737_v16 = vmul.f32 0.5, %v736_v3  ;;  %v788_v14 = vmul.f32 %v1102_v9, %v787_v12  ;;  %v796_v3 = vand.u32 2147483648, %v1652_v11 }
 0x18a   : > { %v674_v13 = vsub.f32 1.5, %v673_v1  ;;  %v777_v25 = vmul.f32 0.5, %v776_v17 }
 0x18b   : > { %v1104_v15 = vpop.eup %1103  ;;  %v738_v20 = vsub.f32 1.5, %v737_v16  ;;  %v789_v40 = vmul.f32 0.5, %v788_v14 }
 0x18c   : > { %v675_v4 = vmul.f32 %v1096_v54, %v674_v13  ;;  %v683_v19 = vmul.f32 %v1104_v15, %v1656_v56  ;;  %v778_v21 = vsub.f32 1.5, %v777_v25  ;;  %v733_v54 = vsel %vm731_vm9, %v732_v22, %v730_v48 }
 0x18d   : > { %v739_v38 = vmul.f32 %v1098_v36, %v738_v20  ;;  %v744_v36 = vand.u32 2147483648, %v1626_v24 }
 0x18e   : > { %v676_v27 = vmul.f32 %v675_v4, %v1634_v7  ;;  %v684_v35 = vmul.f32 %v1104_v15, %v683_v19  ;;  %v779_v39 = vmul.f32 %v1100_v30, %v778_v21 }
 0x18f   : > { %v740_v51 = vmul.f32 %v739_v38, %v1626_v24 }
 0x190   : > { %v678_v31 = vsel %vm677_vm5, %v1634_v7, %v676_v27  ;;  %v685_v37 = vmul.f32 0.5, %v684_v35  ;;  %v790_v7 = vsub.f32 1.5, %v789_v40  ;;  %v780_v46 = vmul.f32 %v779_v39, %v1632_v29 }
 0x191   : > { %v681_v8 = vsel %vm679_vm6, %v680_v32, %v678_v31  ;;  %v742_v58 = vsel %vm741_vm12, %v1626_v24, %v740_v51 }
 0x192   : > { %v686_v44 = vsub.f32 1.5, %v685_v37  ;;  %v694_v50 = vadd.f32 %v681_v8, %v629_v47  ;;  %v791_v45 = vmul.f32 %v1102_v9, %v790_v7  ;;  %v782_v30 = vsel %vm781_vm13, %v1632_v29, %v780_v46 }
 0x193   : > { %v745_v1 = vsel %vm743_vm15, %v744_v36, %v742_v58  ;;  %v785_v2 = vsel %vm783_vm1, %v784_v62, %v782_v30 }
 0x194   : > { %v687_v49 = vmul.f32 %v1104_v15, %v686_v44  ;;  %v792_v57 = vmul.f32 %v791_v45, %v1652_v11  ;;  %v746_v59 = vadd.f32 %v733_v54, %v694_v50 }
 0x196   : > { %v688_v52 = vmul.f32 %v687_v49, %v1656_v56  ;;  %v794_v0 = vsel %vm793_vm14, %v1652_v11, %v792_v57 }
 0x197   : > { %v797_v5 = vsel %vm795_vm2, %v796_v3, %v794_v0 }
 0x198   : > { %v690_v55 = vsel %vm689_vm10, %v1656_v56, %v688_v52  ;;  %v798_v56 = vadd.f32 %v785_v2, %v746_v59 }
 0x199   : > { %v693_v61 = vsel %vm691_vm11, %v692_v53, %v690_v55 }
 0x19a   : > { %v695_v63 = vadd.f32 %v693_v61, %v641_v60  ;;  %v800_v10 = vsel %vm476_vm0, %v798_v56, 0.0 }
 0x19c   : > { %v747_v34 = vadd.f32 %v745_v1, %v695_v63 }
 0x19e   : > { %v799_v9 = vadd.f32 %v797_v5, %v747_v34 }
 0x1a0   : > { %v801_v13 = vsel %vm476_vm0, %v799_v9, 0.0 }
 0x1a1   : > { %v802_v15 = vadd.f32 %v801_v13, %v800_v10 }
 0x1a3   : > { %803 = vadd.xlane.f32.xlu0 %v802_v15 }
 0x1f3   : > { %v493_v24 = vpop.xlane.xlu0 %492 }
 0x1f4   : > { %v494_v29 = vrot.slane %v493_v24, 4 }
 0x1f6   : > { %v495_v23 = vadd.f32 %v494_v29, %v493_v24 }
 0x1f8   : > { %v496_v16 = vrot.slane %v495_v23, 2 }
 0x1fa   : > { %v497_v17 = vadd.f32 %v496_v16, %v495_v23 }
 0x1fc   : > { %v498_v18 = vrot.slane %v497_v17, 1 }
 0x1fe   : > { %v499_v41 = vadd.f32 %v498_v18, %v497_v17 }
 0x200   : > { %1000 = vpush %v499_v41 }
 0x216   : > { %v804_v11 = vpop.xlane.xlu0 %803 }
 0x217   : > { %v805_v4 = vrot.slane %v804_v11, 4 }
 0x219   : > { %v806_v19 = vadd.f32 %v805_v4, %v804_v11 }
 0x21b   : > { %v807_v20 = vrot.slane %v806_v19, 2 }
 0x21d   : > { %v808_v25 = vadd.f32 %v807_v20, %v806_v19 }
 0x21f   : > { %v809_v12 = vrot.slane %v808_v25, 1 }
 0x221   : > { %v810_v26 = vadd.f32 %v809_v12, %v808_v25 }
 0x223   : > { %1002 = vpush %v810_v26 }
 0x231   : > { %s1001_s8 = spop %1000 }
 0x232   : > { %v812_v27 = vstv %s1001_s8 }
 0x233   : > { %813 = vst [vmem:[%s330_s7] sm:$0xff] %v812_v27 }
 0x254   : > { %s1003_s11 = spop %1002 }
 0x255   : > { %v814_v35 = vstv %s1003_s11 }
 0x256   : > { %815 = vst [vmem:[%s334_s26] sm:$0xff] %v814_v35 }
 0x257 PF: > { %p20_p4 = scmp.ge.s32.totalorder %s1355_s12, 4   ;;  %s1751_s18 = smov %s1263_s19 }
 0x258   : > { %s1752_s19 = smov %s1267_s20  ;;  %s1753_s20 = smov %s1366_s16 }
 0x259   : > { %s1754_s21 = smov %s1355_s12  ;;  %22 = sbr.rel (!%p20_p4) target bundleno = 8 (0x8), region = 109 }
 0x25e   :  { %849 = vsyncpa [#allocation3], 1 }
 0x25f   :  { %851 = vsyncpa [#allocation3 + $0x1], 1 }
 0x260   :  { %852 = vsyncpa [#allocation5], 1 }
 0x261   :  { %854 = vsyncpa [#allocation5 + $0x1], 1 }
 0x262   :  { %855 = vsyncpa [#allocation8], 1 }

</bundles_post_ra>
